<compile_context>
chip_gen: v7x
topology: tpu7x:2x2x1
jax: 0.10.0
libtpu: 0.0.40
codegen_flags: <defaults>
</compile_context>

<pallas_src>
import functools

import jax
import jax.numpy as jnp
from jax.experimental import pallas as pl
from jax.experimental.pallas import tpu as pltpu

LANE = 128      # lane (last-dim) tiling unit
SUBLANE = 8     # f32 sublane count


def _round_up(n, m):
    return ((n + m - 1) // m) * m


def _pad2d(a, rows, cols):
    r, c = a.shape
    if r == rows and c == cols:
        return a
    return jnp.pad(a, ((0, rows - r), (0, cols - c)))


def mlp_kernel(x_ref, *refs, use_bf16, transpose_out, last_relu):
    """Fused MLP on one (TB, in_p) batch tile: [Linear -> ReLU]* -> Linear.

    refs = (w0, b0, w1, b1, ..., wL, bL, out_ref). Weights arrive padded (and in bf16
    when use_bf16); biases are (1, out_p) f32. If transpose_out, the output block is a
    lane-major (SUBLANE, TB) slab holding the first SUBLANE output columns transposed.
    """
    out_ref = refs[-1]
    param_refs = refs[:-1]
    n_layers = len(param_refs) // 2
    dot_dtype = jnp.bfloat16 if use_bf16 else jnp.float32

    h = x_ref[...].astype(dot_dtype)          # x already streamed in dot_dtype (no-op cast)
    for i in range(n_layers):
        w = param_refs[2 * i][...].astype(dot_dtype)
        b = param_refs[2 * i + 1][...].astype(jnp.float32)   # (1, out_p), implicit bcast
        h = jnp.dot(h, w, preferred_element_type=jnp.float32) + b
        is_last = i == n_layers - 1
        if (not is_last) or last_relu:
            h = jnp.maximum(h, 0.0)           # ReLU in f32 on the VPU
            # Dropout(p) in eval mode == identity, nothing to do.
        if not is_last:
            h = h.astype(dot_dtype)           # halve the live inter-layer activation

    if transpose_out:
        # Only the first few output columns are real: write them lane-major (XLU
        # transpose is a free slot next to the MXU/VPU work; ~128x less writeback).
        ht = h.T                               # (out_p, TB)
        out_ref[...] = ht[: out_ref.shape[0], :].astype(out_ref.dtype)
    else:
        out_ref[...] = h.astype(out_ref.dtype)  # lane-dense (TB, 128*k) store


def mlp_forward(x, params, *, batch_tile=None, use_bf16=True, last_relu=False):
    """params: list of (w, b) with w:(in,out), b:(1,out) in their *logical* shapes.

    last_relu=False matches output_layer=True (final Linear has no activation);
    last_relu=True matches output_layer=False (every Linear is followed by ReLU).
    """
    batch, in_dim = x.shape
    out_dim = params[-1][0].shape[1]
    stream_dtype = jnp.bfloat16 if use_bf16 else jnp.float32
    out_dtype = x.dtype

    # ---- pad feature dims to lane multiples; store weights in the stream dtype ----
    din_p = _round_up(in_dim, LANE)
    prev_p = din_p
    padded = []
    for w, b in params:
        dout_p = _round_up(w.shape[1], LANE)
        w_p = _pad2d(w.astype(stream_dtype), prev_p, dout_p)
        b_p = _pad2d(b.astype(jnp.float32), 1, dout_p)
        padded.append((w_p, b_p))
        prev_p = dout_p
    out_p = prev_p

    # ---- batch tile: big tiles amortize the ~0.35us/grid-step overhead and fill the
    #      256-deep MXU on v6e/v7x (multiples of 128 also suit v5e); always keep >=2
    #      tiles so the "parallel" axis can shard across both v7x TensorCores. ----
    if batch_tile is None:
        if batch < 128:
            batch_tile = _round_up(max(batch, 1), SUBLANE)
        else:
            batch_tile = 128
            for cand in (256, 512):
                if batch >= 2 * cand:
                    batch_tile = cand
    tb = batch_tile
    batch_p = _round_up(batch, tb)

    # ---- single-pass input prep: cast (bf16 halves the stream) then pad only if needed ----
    x_c = x if x.dtype == stream_dtype else x.astype(stream_dtype)
    if batch_p != batch or din_p != in_dim:
        x_p = jnp.pad(x_c, ((0, batch_p - batch), (0, din_p - in_dim)))
    else:
        x_p = x_c

    grid = (batch_p // tb,)
    transpose_out = out_dim <= SUBLANE

    # ---- specs: x/out tiled over batch; params VMEM-resident (constant index_map) ----
    flat = [x_p]
    in_specs = [pl.BlockSpec((tb, din_p), lambda i: (i, 0))]
    for w_p, b_p in padded:
        flat.extend([w_p, b_p])
        in_specs.append(pl.BlockSpec(w_p.shape, lambda i: (0, 0)))
        in_specs.append(pl.BlockSpec(b_p.shape, lambda i: (0, 0)))
    if transpose_out:
        out_shape = jax.ShapeDtypeStruct((SUBLANE, batch_p), out_dtype)
        out_specs = pl.BlockSpec((SUBLANE, tb), lambda i: (0, i))
        out_elems = SUBLANE * batch_p
        out_tile_elems = SUBLANE * tb
    else:
        out_shape = jax.ShapeDtypeStruct((batch_p, out_p), out_dtype)
        out_specs = pl.BlockSpec((tb, out_p), lambda i: (i, 0))
        out_elems = batch_p * out_p
        out_tile_elems = tb * out_p

    # ---- scheduling hints ----
    out_itemsize = jnp.dtype(out_dtype).itemsize
    param_bytes = sum(w.nbytes + b.nbytes for w, b in padded)
    flops = 2 * batch_p * sum(w.shape[0] * w.shape[1] for w, _ in padded)
    bytes_accessed = int(x_p.nbytes + param_bytes + out_elems * out_itemsize)
    cost = pl.CostEstimate(flops=flops, transcendentals=0,
                           bytes_accessed=bytes_accessed)

    # ---- VMEM budget: double-buffered x/out tiles + (assumed double-buffered)
    #      resident params + f32 activation working set; clamped to the device. ----
    max_feat = max([din_p] + [w.shape[1] for w, _ in padded])
    x_tile_bytes = tb * din_p * jnp.dtype(stream_dtype).itemsize
    out_tile_bytes = out_tile_elems * out_itemsize
    act_bytes = 2 * tb * max_feat * 4
    vmem_need = 2 * param_bytes + 2 * (x_tile_bytes + out_tile_bytes) + act_bytes
    try:
        device_vmem = getattr(pltpu.get_tpu_info(), "vmem_capacity_bytes",
                              64 * 1024 * 1024)
    except Exception:
        device_vmem = 64 * 1024 * 1024   # v7x per-TC floor
    vmem_limit = int(min(max(32 * 1024 * 1024, int(1.3 * vmem_need)),
                         int(0.9 * device_vmem)))
    # TODO(synk): weight-streaming fallback when resident params do not fit (v7x 64 MiB/TC).

    out_padded = pl.pallas_call(
        functools.partial(mlp_kernel, use_bf16=use_bf16,
                          transpose_out=transpose_out, last_relu=last_relu),
        out_shape=out_shape,
        grid=grid,
        in_specs=in_specs,
        out_specs=out_specs,
        compiler_params=pltpu.CompilerParams(
            dimension_semantics=("parallel",),
            vmem_limit_bytes=vmem_limit),
        cost_estimate=cost,
    )(*flat)

    if transpose_out:
        return out_padded[:out_dim, :batch].T      # (batch, out_dim), already x.dtype
    return out_padded[:batch, :out_dim]


def init_mlp_params(key, input_dim, embed_dims, output_layer=True):
    """Deterministic init matching PyTorch nn.Linear default (U(-1/sqrt(in), 1/sqrt(in)))."""
    params = []
    dims = list(embed_dims) + ([1] if output_layer else [])
    in_dim = input_dim
    for out_dim in dims:
        key, kw, kb = jax.random.split(key, 3)
        bound = 1.0 / jnp.sqrt(in_dim)
        w = jax.random.uniform(kw, (in_dim, out_dim), jnp.float32, -bound, bound)
        b = jax.random.uniform(kb, (1, out_dim), jnp.float32, -bound, bound)
        params.append((w, b))
        in_dim = out_dim
    return params


def mlp_reference(x, params, use_bf16=True, last_relu=False):
    """Pure-JAX reference (mimicking the bf16-operand / f32-accum path when use_bf16)."""
    h = x.astype(jnp.float32)
    n = len(params)
    for i, (w, b) in enumerate(params):
        hd = h.astype(jnp.bfloat16) if use_bf16 else h
        wd = w.astype(jnp.bfloat16) if use_bf16 else w
        h = jnp.dot(hd, wd, preferred_element_type=jnp.float32) + b
        if i < n - 1 or last_relu:
            h = jnp.maximum(h, 0.0)
    return h


if __name__ == "__main__":
    key = jax.random.PRNGKey(0)
    batch, input_dim = 2, 16
    embed_dims = (32, 16)
    dropout = 0.2  # inference mode -> identity

    kx, kp, kx2, kx3 = jax.random.split(key, 4)
    x = jax.random.normal(kx, (batch, input_dim), jnp.float32)
    params = init_mlp_params(kp, input_dim, embed_dims, output_layer=True)

    # small-batch check (single tile, transposed lane-major output path)
    out = jax.block_until_ready(mlp_forward(x, params))
    assert out.shape == (batch, 1), out.shape
    ref_bf16 = mlp_reference(x, params, use_bf16=True)
    ref_f32 = mlp_reference(x, params, use_bf16=False)
    assert jnp.allclose(out, ref_bf16, atol=1e-3, rtol=1e-3), (out, ref_bf16)
    assert jnp.allclose(out, ref_f32, atol=2e-2, rtol=2e-2), (out, ref_f32)

    # larger batch (not a tile multiple): multi-tile grid + row padding
    batch2 = 200
    x2 = jax.random.normal(kx2, (batch2, input_dim), jnp.float32)
    out2 = jax.block_until_ready(mlp_forward(x2, params))
    assert out2.shape == (batch2, 1), out2.shape
    ref2 = mlp_reference(x2, params, use_bf16=True)
    assert jnp.allclose(out2, ref2, atol=1e-3, rtol=1e-3), (out2, ref2)

    # big batch: exercises the 512-row tiles (>=2 tiles for v7x megacore)
    batch3 = 1030
    x3 = jax.random.normal(kx3, (batch3, input_dim), jnp.float32)
    out3 = jax.block_until_ready(mlp_forward(x3, params))
    assert out3.shape == (batch3, 1), out3.shape
    ref3 = mlp_reference(x3, params, use_bf16=True)
    assert jnp.allclose(out3, ref3, atol=1e-3, rtol=1e-3), (out3, ref3)

    # output_layer=False variant: every Linear followed by ReLU, wide (lane-dense) output path
    params_no_out = init_mlp_params(kp, input_dim, embed_dims, output_layer=False)
    out4 = jax.block_until_ready(mlp_forward(x, params_no_out, last_relu=True))
    assert out4.shape == (batch, embed_dims[-1]), out4.shape
    ref4 = mlp_reference(x, params_no_out, use_bf16=True, last_relu=True)
    assert jnp.allclose(out4, ref4, atol=1e-3, rtol=1e-3), (out4, ref4)

    print("KERNEL_OK")
</pallas_src>

<mosaic_0001>
module attributes {stable_mosaic.version = 11 : i64} {
  func.func @mlp_kernel(%arg0: i32, %arg1: memref<8x128xbf16, #tpu.memory_space<vmem>>, %arg2: memref<128x128xbf16, #tpu.memory_space<vmem>>, %arg3: memref<1x128xf32, #tpu.memory_space<vmem>>, %arg4: memref<128x128xbf16, #tpu.memory_space<vmem>>, %arg5: memref<1x128xf32, #tpu.memory_space<vmem>>, %arg6: memref<128x128xbf16, #tpu.memory_space<vmem>>, %arg7: memref<1x128xf32, #tpu.memory_space<vmem>>, %arg8: memref<8x8xf32, #tpu.memory_space<vmem>>) attributes {dimension_semantics = [#tpu.dimension_semantics<parallel>], iteration_bounds = array<i64: 1>, scalar_prefetch = 0 : i64, scratch_operands = 0 : i64, tpu.core_type = #tpu.core_type<tc>, window_params = [{transform_indices = @transform_0, window_bounds = array<i64: 8, 128>}, {pipeline_mode = #tpu.pipeline_mode<synchronous>, transform_indices = @transform_1, window_bounds = array<i64: 128, 128>}, {pipeline_mode = #tpu.pipeline_mode<synchronous>, transform_indices = @transform_2, window_bounds = array<i64: 1, 128>}, {pipeline_mode = #tpu.pipeline_mode<synchronous>, transform_indices = @transform_3, window_bounds = array<i64: 128, 128>}, {pipeline_mode = #tpu.pipeline_mode<synchronous>, transform_indices = @transform_4, window_bounds = array<i64: 1, 128>}, {pipeline_mode = #tpu.pipeline_mode<synchronous>, transform_indices = @transform_5, window_bounds = array<i64: 128, 128>}, {pipeline_mode = #tpu.pipeline_mode<synchronous>, transform_indices = @transform_6, window_bounds = array<i64: 1, 128>}, {transform_indices = @transform_7, window_bounds = array<i64: 8, 8>}]} {
    %c0 = arith.constant 0 : index
    %c0_0 = arith.constant 0 : index
    %0 = vector.load %arg1[%c0, %c0_0] : memref<8x128xbf16, #tpu.memory_space<vmem>>, vector<8x128xbf16>
    %c0_1 = arith.constant 0 : index
    %c0_2 = arith.constant 0 : index
    %1 = vector.load %arg2[%c0_1, %c0_2] : memref<128x128xbf16, #tpu.memory_space<vmem>>, vector<128x128xbf16>
    %c0_3 = arith.constant 0 : index
    %c0_4 = arith.constant 0 : index
    %2 = vector.load %arg3[%c0_3, %c0_4] : memref<1x128xf32, #tpu.memory_space<vmem>>, vector<1x128xf32>
    %cst = arith.constant dense<0.000000e+00> : vector<8x128xf32>
    %3 = tpu.matmul %0, %1, %cst {dimension_numbers = #tpu.dot_dimension_numbers<[1], [0], [0], [1], [0, 0, 1, 1], [], []>} : vector<8x128xbf16>, vector<128x128xbf16>, vector<8x128xf32> -> vector<8x128xf32>
    %4 = vector.broadcast %2 : vector<1x128xf32> to vector<8x128xf32>
    %5 = arith.addf %3, %4 : vector<8x128xf32>
    %cst_5 = arith.constant 0.000000e+00 : f32
    %6 = vector.broadcast %cst_5 : f32 to vector<8x128xf32>
    %7 = arith.maximumf %5, %6 : vector<8x128xf32>
    %8 = arith.truncf %7 : vector<8x128xf32> to vector<8x128xbf16>
    %c0_6 = arith.constant 0 : index
    %c0_7 = arith.constant 0 : index
    %9 = vector.load %arg4[%c0_6, %c0_7] : memref<128x128xbf16, #tpu.memory_space<vmem>>, vector<128x128xbf16>
    %c0_8 = arith.constant 0 : index
    %c0_9 = arith.constant 0 : index
    %10 = vector.load %arg5[%c0_8, %c0_9] : memref<1x128xf32, #tpu.memory_space<vmem>>, vector<1x128xf32>
    %cst_10 = arith.constant dense<0.000000e+00> : vector<8x128xf32>
    %11 = tpu.matmul %8, %9, %cst_10 {dimension_numbers = #tpu.dot_dimension_numbers<[1], [0], [0], [1], [0, 0, 1, 1], [], []>} : vector<8x128xbf16>, vector<128x128xbf16>, vector<8x128xf32> -> vector<8x128xf32>
    %12 = vector.broadcast %10 : vector<1x128xf32> to vector<8x128xf32>
    %13 = arith.addf %11, %12 : vector<8x128xf32>
    %cst_11 = arith.constant 0.000000e+00 : f32
    %14 = vector.broadcast %cst_11 : f32 to vector<8x128xf32>
    %15 = arith.maximumf %13, %14 : vector<8x128xf32>
    %16 = arith.truncf %15 : vector<8x128xf32> to vector<8x128xbf16>
    %c0_12 = arith.constant 0 : index
    %c0_13 = arith.constant 0 : index
    %17 = vector.load %arg6[%c0_12, %c0_13] : memref<128x128xbf16, #tpu.memory_space<vmem>>, vector<128x128xbf16>
    %c0_14 = arith.constant 0 : index
    %c0_15 = arith.constant 0 : index
    %18 = vector.load %arg7[%c0_14, %c0_15] : memref<1x128xf32, #tpu.memory_space<vmem>>, vector<1x128xf32>
    %cst_16 = arith.constant dense<0.000000e+00> : vector<8x128xf32>
    %19 = tpu.matmul %16, %17, %cst_16 {dimension_numbers = #tpu.dot_dimension_numbers<[1], [0], [0], [1], [0, 0, 1, 1], [], []>} : vector<8x128xbf16>, vector<128x128xbf16>, vector<8x128xf32> -> vector<8x128xf32>
    %20 = vector.broadcast %18 : vector<1x128xf32> to vector<8x128xf32>
    %21 = arith.addf %19, %20 : vector<8x128xf32>
    %22 = tpu.transpose %21, [1, 0] : vector<8x128xf32> -> vector<128x8xf32>
    %23 = vector.extract_strided_slice %22 {offsets = [0, 0], sizes = [8, 8], strides = [1, 1]} : vector<128x8xf32> to vector<8x8xf32>
    %c0_17 = arith.constant 0 : index
    %c0_18 = arith.constant 0 : index
    %24 = vector.load %arg8[%c0_17, %c0_18] : memref<8x8xf32, #tpu.memory_space<vmem>>, vector<8x8xf32>
    tpu.vector_store %arg8[%c0_17, %c0_18], %23 {strides = array<i32>} : memref<8x8xf32, #tpu.memory_space<vmem>>, vector<8x8xf32>,
    return
  }
  func.func @transform_0(%arg0: i32) -> (i32, i32) {
    %c0_i32 = arith.constant 0 : i32
    %c0_i32_0 = arith.constant 0 : i32
    return %arg0, %c0_i32 : i32, i32
  }
  func.func @transform_1(%arg0: i32) -> (i32, i32) {
    %c0_i32 = arith.constant 0 : i32
    %c0_i32_0 = arith.constant 0 : i32
    %c0_i32_1 = arith.constant 0 : i32
    return %c0_i32, %c0_i32_0 : i32, i32
  }
  func.func @transform_2(%arg0: i32) -> (i32, i32) {
    %c0_i32 = arith.constant 0 : i32
    %c0_i32_0 = arith.constant 0 : i32
    %c0_i32_1 = arith.constant 0 : i32
    return %c0_i32, %c0_i32_0 : i32, i32
  }
  func.func @transform_3(%arg0: i32) -> (i32, i32) {
    %c0_i32 = arith.constant 0 : i32
    %c0_i32_0 = arith.constant 0 : i32
    %c0_i32_1 = arith.constant 0 : i32
    return %c0_i32, %c0_i32_0 : i32, i32
  }
  func.func @transform_4(%arg0: i32) -> (i32, i32) {
    %c0_i32 = arith.constant 0 : i32
    %c0_i32_0 = arith.constant 0 : i32
    %c0_i32_1 = arith.constant 0 : i32
    return %c0_i32, %c0_i32_0 : i32, i32
  }
  func.func @transform_5(%arg0: i32) -> (i32, i32) {
    %c0_i32 = arith.constant 0 : i32
    %c0_i32_0 = arith.constant 0 : i32
    %c0_i32_1 = arith.constant 0 : i32
    return %c0_i32, %c0_i32_0 : i32, i32
  }
  func.func @transform_6(%arg0: i32) -> (i32, i32) {
    %c0_i32 = arith.constant 0 : i32
    %c0_i32_0 = arith.constant 0 : i32
    %c0_i32_1 = arith.constant 0 : i32
    return %c0_i32, %c0_i32_0 : i32, i32
  }
  func.func @transform_7(%arg0: i32) -> (i32, i32) {
    %c0_i32 = arith.constant 0 : i32
    %c0_i32_0 = arith.constant 0 : i32
    return %c0_i32, %arg0 : i32, i32
  }
}

</mosaic_0001>

<bundles_post_ra>
// kernel: tpu_custom_call.1
= control target key start
LH: loop header
LB: loop body
LE: loop exit
PB: predicated region body
PF: predicated region fallthrough
CT: control target
= control target key end

     0   :  { %12 = vsyncpa [#allocation3], 0  ;;  %s892_s0 = inlined_call_operand.hbm [shape: bf16[8,128], index: 0, kind: input, shape index: {}]   ;;  %s893_s1 = inlined_call_operand.hbm [shape: bf16[128,128], index: 1, kind: input, shape index: {}]   ;;  %s894_s2 = inlined_call_operand.vmem [shape: f32[1,128], index: 2, kind: input, shape index: {}]   ;;  %s895_s3 = inlined_call_operand.hbm [shape: bf16[128,128], index: 3, kind: input, shape index: {}]   ;;  %s896_s4 = inlined_call_operand.vmem [shape: f32[1,128], index: 4, kind: input, shape index: {}]   ;;  %s897_s5 = inlined_call_operand.hbm [shape: bf16[128,128], index: 5, kind: input, shape index: {}]   ;;  %s898_s6 = inlined_call_operand.vmem [shape: f32[1,128], index: 6, kind: input, shape index: {}]   ;;  %s899_s7 = inlined_call_operand.hbm [shape: f32[8,8], index: 7, kind: output, shape index: {}]  }
   0x1   :  { %13 = vsyncpa [#allocation6], 0 }
   0x2   :  { %14 = vsyncpa [#allocation9], 0 }
   0x3   :  { %15 = vsyncpa [#allocation4], 0  ;;  %s735_s24 = smov [#allocation5]   ;;  %s617_s28 = scalar_lea.hbm %s893_s1, 1024 }
   0x4   :  { %s31_s25 = sshll.u32 %s735_s24, 4  ;;  %p618_p0 = scmp.ne.s32.totalorder %s893_s1, %s617_s28  ;;  %s32_s25 = int_to_ptr.vmem [resolvable:$true] %s31_s25 }
   0x5   :  { %p621_p1 = scmp.lt.u32.totalorder %s617_s28, %s893_s1 }
   0x7   :  { %p623_p2 = pnand %p621_p1, %p618_p0 }
   0x9   :  { %626 = shalt.err (!%p623_p2)
}
   0xa   :  { %s627_s10 = scalar_lea.vmem %s32_s25, 1024  ;;  %p632_p4 = scmp.lt.s32.totalorder %s32_s25, %s32_s25 }
   0xb   :  { %p628_p3 = scmp.ne.s32.totalorder %s32_s25, %s627_s10  ;;  %p633_p5 = scmp.lt.s32.totalorder %s627_s10, %s627_s10 }
   0xd   :  { %p634_p6 = por %p633_p5, %p632_p4 }
   0xf   :  { %p635_p7 = pnand %p634_p6, %p628_p3 }
  0x11   :  { %638 = shalt.err (!%p635_p7)
}
  0x12   :  { %s736_s11 = smov 64   ;;  %s737_s12 = smov 4  }
  0x13   :  { %37 = dma.hbm_to_vmem [thread:$0]  %s893_s1, 1024, %s32_s25, [#allocation6], %s736_s11, %s736_s11, %s737_s12  }
  0x14   :  { %s738_s15 = smov [#allocation2]   ;;  %s739_s17 = smov [#allocation7]  }
  0x15   :  { %s22_s16 = sshll.u32 %s738_s15, 4  ;;  %s45_s18 = sshll.u32 %s739_s17, 4  ;;  %s23_s16 = int_to_ptr.vmem [resolvable:$true] %s22_s16  ;;  %s46_s18 = int_to_ptr.vmem [resolvable:$true] %s45_s18 }
  0x16   :  { %s639_s21 = scalar_lea.hbm %s892_s0, 64 }
  0x17   :  { %p640_p8 = scmp.ne.s32.totalorder %s892_s0, %s639_s21  ;;  %p643_p9 = scmp.lt.u32.totalorder %s639_s21, %s892_s0 }
  0x19   :  { %p645_p10 = pnand %p643_p9, %p640_p8 }
  0x1b   :  { %648 = shalt.err (!%p645_p10)
}
  0x1c   :  { %s649_s1 = scalar_lea.vmem %s23_s16, 64  ;;  %p654_p12 = scmp.lt.s32.totalorder %s23_s16, %s23_s16 }
  0x1d   :  { %p650_p11 = scmp.ne.s32.totalorder %s23_s16, %s649_s1  ;;  %p655_p13 = scmp.lt.s32.totalorder %s649_s1, %s649_s1 }
  0x1f   :  { %p656_p0 = por %p655_p13, %p654_p12 }
  0x21   :  { %p657_p1 = pnand %p656_p0, %p650_p11 }
  0x23   :  { %660 = shalt.err (!%p657_p1)
}
  0x24   :  { %25 = dma.hbm_to_vmem [thread:$0]  %s892_s0, 64, %s23_s16, [#allocation3]  }
  0x25   :  { %s661_s30 = scalar_lea.hbm %s895_s3, 1024 }
  0x26   :  { %p662_p2 = scmp.ne.s32.totalorder %s895_s3, %s661_s30  ;;  %p665_p3 = scmp.lt.u32.totalorder %s661_s30, %s895_s3 }
  0x28   :  { %p667_p4 = pnand %p665_p3, %p662_p2 }
  0x2a   :  { %670 = shalt.err (!%p667_p4)
}
  0x2b   :  { %s671_s14 = scalar_lea.vmem %s46_s18, 1024  ;;  %p676_p6 = scmp.lt.s32.totalorder %s46_s18, %s46_s18 }
  0x2c   :  { %p672_p5 = scmp.ne.s32.totalorder %s46_s18, %s671_s14  ;;  %p677_p7 = scmp.lt.s32.totalorder %s671_s14, %s671_s14 }
  0x2e   :  { %p678_p8 = por %p677_p7, %p676_p6 }
  0x30   :  { %p679_p9 = pnand %p678_p8, %p672_p5 }
  0x32   :  { %682 = shalt.err (!%p679_p9)
}
  0x33   :  { %51 = dma.hbm_to_vmem [thread:$0]  %s895_s3, 1024, %s46_s18, [#allocation6], %s736_s11, %s736_s11, %s737_s12  }
  0x34   :  { %s740_s16 = smov [#allocation8]   ;;  %s683_s21 = scalar_lea.hbm %s897_s5, 1024 }
  0x35   :  { %s59_s17 = sshll.u32 %s740_s16, 4  ;;  %p684_p10 = scmp.ne.s32.totalorder %s897_s5, %s683_s21  ;;  %s60_s17 = int_to_ptr.vmem [resolvable:$true] %s59_s17 }
  0x36   :  { %p687_p11 = scmp.lt.u32.totalorder %s683_s21, %s897_s5 }
  0x38   :  { %p689_p12 = pnand %p687_p11, %p684_p10 }
  0x3a   :  { %692 = shalt.err (!%p689_p12)
}
  0x3b   :  { %s693_s1 = scalar_lea.vmem %s60_s17, 1024  ;;  %p698_p0 = scmp.lt.s32.totalorder %s60_s17, %s60_s17 }
  0x3c   :  { %p694_p13 = scmp.ne.s32.totalorder %s60_s17, %s693_s1  ;;  %p699_p1 = scmp.lt.s32.totalorder %s693_s1, %s693_s1 }
  0x3e   :  { %p700_p2 = por %p699_p1, %p698_p0 }
  0x40   :  { %p701_p3 = pnand %p700_p2, %p694_p13 }
  0x42   :  { %704 = shalt.err (!%p701_p3)
}
  0x43   :  { %65 = dma.hbm_to_vmem [thread:$0]  %s897_s5, 1024, %s60_s17, [#allocation9], %s736_s11, %s736_s11, %s737_s12  }
  0x44   :  { %727 = dma.done.wait [#allocation3], 64  }
  0x45   :  { %728 = vsyncadd [#allocation3], 4294967232 }
  0x46   :  { %729 = dma.done.wait [#allocation6], 2048  }
  0x47   :  { %730 = vsyncadd [#allocation6], 4294965248 }
  0x48   :  { %731 = dma.done.wait [#allocation9], 1024  }
  0x49   :  { %732 = vsyncadd [#allocation9], 4294966272  ;;  %v741_v0 = vmov 0.0   ;;  %vm742_vm0 = vmmov 0   ;;  %v593_v1 = vld [vmem:[#allocation5] sm:$0xff]   ;;  %v594_v2 = vld [vmem:[#allocation5 + $0x8] sm:$0xff]  }
  0x4a   :  { %524 = vmatprep.subr.bf16.mxu0 %v741_v0  ;;  %540 = vmatprep.mubr.msk.bf16.mxu0 %vm742_vm0, %v741_v0  ;;  %v595_v3 = vld [vmem:[#allocation5 + $0x10] sm:$0xff]   ;;  %v601_v4 = vld [vmem:[#allocation7] sm:$0xff]   ;;  %v596_v5 = vld [vmem:[#allocation5 + $0x18] sm:$0xff]   ;;  %s743_s28 = smov [#allocation10]   ;;  %vm451_vm1 = vcmask 64512  }
  0x4b   :  { %544 = vmatprep.subr.bf16.mxu1 %v741_v0  ;;  %560 = vmatprep.mubr.msk.bf16.mxu1 %vm742_vm0, %v741_v0  ;;  %v602_v6 = vld [vmem:[#allocation7 + $0x8] sm:$0xff]   ;;  %v597_v7 = vld [vmem:[#allocation5 + $0x20] sm:$0xff]   ;;  %v603_v8 = vld [vmem:[#allocation7 + $0x10] sm:$0xff]  }
  0x4c   :  { %525 = vmatpush3.bf16.msra.mxu0 %v593_v1  ;;  %545 = vmatpush3.bf16.msra.mxu1 %v601_v4  ;;  %v598_v9 = vld [vmem:[#allocation5 + $0x28] sm:$0xff]   ;;  %v604_v10 = vld [vmem:[#allocation7 + $0x18] sm:$0xff]   ;;  %v599_v11 = vld [vmem:[#allocation5 + $0x30] sm:$0xff]  }
  0x4d   :  { %526 = vmatprep.subr.bf16.mxu0 %v741_v0  ;;  %546 = vmatprep.subr.bf16.mxu1 %v741_v0  ;;  %v605_v12 = vld [vmem:[#allocation7 + $0x20] sm:$0xff]   ;;  %v600_v13 = vld [vmem:[#allocation5 + $0x38] sm:$0xff]   ;;  %v606_v14 = vld [vmem:[#allocation7 + $0x28] sm:$0xff]  }
  0x4e   :  { %v81_v15 = vld [vmem:[#allocation2] sm:$0xf]  ;;  %v607_v16 = vld [vmem:[#allocation7 + $0x30] sm:$0xff]   ;;  %v609_v18 = vld [vmem:[#allocation8] sm:$0xff]  }
  0x4f   :  { %v608_v17 = vld [vmem:[#allocation7 + $0x38] sm:$0xff]   ;;  %v610_v19 = vld [vmem:[#allocation8 + $0x8] sm:$0xff]   ;;  %v611_v20 = vld [vmem:[#allocation8 + $0x10] sm:$0xff]  }
  0x50   :  { %527 = vmatpush3.bf16.msra.mxu0 %v594_v2  ;;  %547 = vmatpush3.bf16.msra.mxu1 %v602_v6  ;;  %v612_v21 = vld [vmem:[#allocation8 + $0x18] sm:$0xff]   ;;  %v613_v22 = vld [vmem:[#allocation8 + $0x20] sm:$0xff]   ;;  %v614_v23 = vld [vmem:[#allocation8 + $0x28] sm:$0xff]  }
  0x51   :  { %528 = vmatprep.subr.bf16.mxu0 %v741_v0  ;;  %548 = vmatprep.subr.bf16.mxu1 %v741_v0  ;;  %v470_v24 = vld [vmem:[%s894_s2] ss:$0 sm:$0xff]  ;;  %v615_v32 = vld [vmem:[#allocation8 + $0x30] sm:$0xff]  }
  0x52   :  { %v616_v33 = vld [vmem:[#allocation8 + $0x38] sm:$0xff]  }
  0x53   :  { %v479_v34 = vld [vmem:[%s896_s4] ss:$0 sm:$0xff]  ;;  %s459_s4 = sshll.u32 %s743_s28, 4  ;;  %s460_s4 = int_to_ptr.vmem [resolvable:$true] %s459_s4 }
  0x54   :  { %529 = vmatpush3.bf16.msra.mxu0 %v595_v3  ;;  %549 = vmatpush3.bf16.msra.mxu1 %v603_v8  ;;  %v488_v42 = vld [vmem:[%s898_s6] ss:$0 sm:$0xff]  ;;  %s705_s29 = scalar_lea.vmem %s460_s4, 128  ;;  %p710_p5 = scmp.lt.s32.totalorder %s460_s4, %s460_s4 }
  0x55   :  { %530 = vmatprep.subr.bf16.mxu0 %v741_v0  ;;  %550 = vmatprep.subr.bf16.mxu1 %v741_v0  ;;  %p706_p4 = scmp.ne.s32.totalorder %s460_s4, %s705_s29  ;;  %p711_p6 = scmp.lt.s32.totalorder %s705_s29, %s705_s29 }
  0x57   :  { %p712_p7 = por %p711_p6, %p710_p5 }
  0x58   :  { %531 = vmatpush3.bf16.msra.mxu0 %v596_v5  ;;  %551 = vmatpush3.bf16.msra.mxu1 %v604_v10 }
  0x59   :  { %532 = vmatprep.subr.bf16.mxu0 %v741_v0  ;;  %552 = vmatprep.subr.bf16.mxu1 %v741_v0  ;;  %p713_p8 = pnand %p712_p7, %p706_p4 }
  0x5c   :  { %533 = vmatpush3.bf16.msra.mxu0 %v597_v7  ;;  %553 = vmatpush3.bf16.msra.mxu1 %v605_v12 }
  0x5d   :  { %534 = vmatprep.subr.bf16.mxu0 %v741_v0  ;;  %554 = vmatprep.subr.bf16.mxu1 %v741_v0 }
  0x60   :  { %535 = vmatpush3.bf16.msra.mxu0 %v598_v9  ;;  %555 = vmatpush3.bf16.msra.mxu1 %v606_v14 }
  0x61   :  { %536 = vmatprep.subr.bf16.mxu0 %v741_v0  ;;  %556 = vmatprep.subr.bf16.mxu1 %v741_v0 }
  0x64   :  { %537 = vmatpush3.bf16.msra.mxu0 %v599_v11  ;;  %557 = vmatpush3.bf16.msra.mxu1 %v607_v16 }
  0x65   :  { %538 = vmatprep.subr.bf16.mxu0 %v741_v0  ;;  %558 = vmatprep.subr.bf16.mxu1 %v741_v0 }
  0x68   :  { %539 = vmatpush3.bf16.msra.mxu0 %v600_v13  ;;  %559 = vmatpush3.bf16.msra.mxu1 %v608_v17 }
  0x69   :  { %564 = vmatprep.subr.bf16.mxu0 %v741_v0 }
  0x6b   :  { %541 = vmatmul.mubr.bf16.vlgmr.msra.gmra.mrb[0].mxu0 %v81_v15 }
  0x6c   :  { %580 = vmatprep.mubr.msk.bf16.mxu0 %vm742_vm0, %v741_v0  ;;  %565 = vmatpush3.bf16.msra.mxu0 %v609_v18 }
  0x6d   :  { %566 = vmatprep.subr.bf16.mxu0 %v741_v0 }
  0x70   :  { %567 = vmatpush3.bf16.msra.mxu0 %v610_v19 }
  0x71   :  { %568 = vmatprep.subr.bf16.mxu0 %v741_v0 }
  0x74   :  { %569 = vmatpush3.bf16.msra.mxu0 %v611_v20 }
  0x75   :  { %570 = vmatprep.subr.bf16.mxu0 %v741_v0 }
  0x78   :  { %571 = vmatpush3.bf16.msra.mxu0 %v612_v21 }
  0x79   :  { %572 = vmatprep.subr.bf16.mxu0 %v741_v0 }
  0x7c   :  { %573 = vmatpush3.bf16.msra.mxu0 %v613_v22 }
  0x7d   :  { %574 = vmatprep.subr.bf16.mxu0 %v741_v0 }
  0x80   :  { %575 = vmatpush3.bf16.msra.mxu0 %v614_v23 }
  0x81   :  { %576 = vmatprep.subr.bf16.mxu0 %v741_v0 }
  0x84   :  { %577 = vmatpush3.bf16.msra.mxu0 %v615_v32 }
  0x85   :  { %578 = vmatprep.subr.bf16.mxu0 %v741_v0 }
  0x88   :  { %579 = vmatpush3.bf16.msra.mxu0 %v616_v33 }
 0x13e   :  { %v187_v25 = vpop.f32.mrb[0].mxu0 }
 0x13f   :  { %v188_v26 = vadd.f32 %v470_v24, %v187_v25  ;;  %v542_v27 = vpop.f32.mrb[1].mxu0 }
 0x140   :  { %v190_v28 = vpop.f32.mrb[2].mxu0 }
 0x141   :  { %v193_v29 = vmax.f32 %v188_v26, 0.0  ;;  %v543_v30 = vpop.f32.mrb[3].mxu0 }
 0x143   :  { %v194_v31 = vpack.c.bf16 %v193_v29, %v193_v29 }
 0x145   :  { %561 = vmatmul.mubr.bf16.vlgmr.msra.gmra.mrb[0].mxu1 %v194_v31 }
 0x218   :  { %v300_v35 = vpop.f32.mrb[0].mxu1 }
 0x219   :  { %v301_v36 = vadd.f32 %v479_v34, %v300_v35  ;;  %v562_v37 = vpop.f32.mrb[1].mxu1 }
 0x21a   :  { %v303_v38 = vpop.f32.mrb[2].mxu1 }
 0x21b   :  { %v306_v39 = vmax.f32 %v301_v36, 0.0  ;;  %v563_v40 = vpop.f32.mrb[3].mxu1 }
 0x21d   :  { %v307_v41 = vpack.c.bf16 %v306_v39, %v306_v39 }
 0x21f   :  { %581 = vmatmul.mubr.bf16.vlgmr.msra.gmra.mrb[4].mxu0 %v307_v41 }
 0x2f2   :  { %v413_v43 = vpop.f32.mrb[4].mxu0 }
 0x2f3   :  { %v582_v44 = vpop.f32.mrb[5].mxu0  ;;  %v414_v45 = vadd.f32 %v488_v42, %v413_v43 }
 0x2f4   :  { %v416_v46 = vpop.f32.mrb[6].mxu0 }
 0x2f5   :  { %419 = vxpose.xlu0.b32.start.end [1/1] (short) (narrow) %v414_v45, 8  ;;  %v583_v47 = vpop.f32.mrb[7].mxu0 }
 0x375   :  { %v435_v48 = vpop.trf.xlu0 }
 0x376   :  { %452 = vst.msk [vmem:[#allocation10] sm:$0xff] %vm451_vm1, %v435_v48 }
 0x377   :  { %716 = shalt.err (!%p713_p8)
}
 0x378   :  { %s717_s8 = scalar_lea.hbm %s899_s7, 128 }
 0x379   :  { %p718_p9 = scmp.ne.s32.totalorder %s899_s7, %s717_s8  ;;  %p721_p10 = scmp.lt.u32.totalorder %s717_s8, %s899_s7 }
 0x37b   :  { %p723_p11 = pnand %p721_p10, %p718_p9 }
 0x37d   :  { %726 = shalt.err (!%p723_p11)
}
 0x37e   :  { %462 = dma.vmem_to_hbm [thread:$0]  %s460_s4, 128, %s899_s7, [#allocation4]  }
 0x37f   :  { %733 = dma.done.wait [#allocation4], 128  }
 0x380   :  { %734 = vsyncadd [#allocation4], 4294967168 }
 0x381   :  { %466 = vsyncpa [#allocation3], 1 }
 0x382   :  { %467 = vsyncpa [#allocation6], 1 }
 0x383   :  { %468 = vsyncpa [#allocation9], 1 }
 0x384   :  { %469 = vsyncpa [#allocation4], 1 }

</bundles_post_ra>
